<compile_context>
chip_gen: v7x
topology: tpu7x:2x2x1
jax: 0.10.0
libtpu: 0.0.40
codegen_flags: <defaults>
</compile_context>

<pallas_src>
import functools

import jax
import jax.numpy as jnp
from jax.experimental import pallas as pl
from jax.experimental.pallas import tpu as pltpu

BN_EPS = 1e-5
LANE = 128
# Rows (MXU M-dim) packed per grid step: >=256 fills v6e/v7x MXU, >=128 on v5e.
_MAX_ROWS_PER_STEP = 512


def _round_up(n, m):
    return ((n + m - 1) // m) * m


def _pad_to(a, shape):
    pads = [(0, t - s) for s, t in zip(a.shape, shape)]
    if all(p == (0, 0) for p in pads):
        return a
    return jnp.pad(a, pads)


def _choose_episodes_per_step(n_episodes, batch, max_rows=_MAX_ROWS_PER_STEP):
    """Largest divisor of n_episodes whose packed row count fits max_rows."""
    best = 1
    for d in range(1, n_episodes + 1):
        if n_episodes % d == 0 and d * batch <= max_rows:
            best = d
    return best


def prepare_params(params, compute_dtype=jnp.bfloat16):
    """Pad + cast parameters ONCE (hoisted out of the per-call hot path).

    * Weights are zero-padded so every matmul N-dim and both output stores are
      128-lane dense (unmasked vst, full MXU tiles) and cast to compute_dtype
      (bf16 by default -> MXU peak rate, half the weight DMA/VMEM bytes).
    * gamma/beta/classifier bias stay f32 (BN math is done in f32).
    * Linear biases b1/b2 are intentionally dropped: training-mode BatchNorm1d
      subtracts the batch mean, so a per-feature constant bias cancels exactly.
    * Padded feature columns stay exactly zero through BN because gamma/beta
      padding is zero (scale=0, shift=0).
    """
    d_in, hid = params["w1"].shape
    ncls = params["wc"].shape[1]
    hp = _round_up(hid, LANE)
    cp = _round_up(ncls, LANE)
    return dict(
        w1=_pad_to(params["w1"], (d_in, hp)).astype(compute_dtype),
        g1=_pad_to(params["g1"], (1, hp)).astype(jnp.float32),
        beta1=_pad_to(params["beta1"], (1, hp)).astype(jnp.float32),
        w2=_pad_to(params["w2"], (hp, hp)).astype(compute_dtype),
        g2=_pad_to(params["g2"], (1, hp)).astype(jnp.float32),
        beta2=_pad_to(params["beta2"], (1, hp)).astype(jnp.float32),
        wc=_pad_to(params["wc"], (hp, cp)).astype(compute_dtype),
        bc=_pad_to(params["bc"], (1, cp)).astype(jnp.float32),
        input_dim=d_in, hid=hid, ncls=ncls, hp=hp, cp=cp,
        compute_dtype=compute_dtype,
    )


def _mlp_kernel(n_ep, batch,
                x_ref,
                w1_ref, g1_ref, beta1_ref,
                w2_ref, g2_ref, beta2_ref,
                wc_ref, bc_ref,
                logits_ref, feat_ref):
    # One grid step == n_ep episodes packed as an (n_ep*batch, D) slab.
    rows = n_ep * batch
    x = x_ref[...]                                    # (rows, D), compute dtype

    def bn_relu(h2d, g, beta):
        # Per-episode training-mode BatchNorm folded into one FMA, then ReLU.
        h3 = h2d.reshape(n_ep, batch, h2d.shape[-1])   # (E, B, H); B=8 aligns sublanes
        mu = jnp.mean(h3, axis=1, keepdims=True)       # (E, 1, H)
        var = jnp.maximum(jnp.mean(h3 * h3, axis=1, keepdims=True) - mu * mu, 0.0)
        scale = g * jax.lax.rsqrt(var + BN_EPS)        # rsqrt -> EUP slot
        shift = beta - mu * scale
        return jnp.maximum(h3 * scale + shift, 0.0).reshape(rows, h2d.shape[-1])

    def cast(v, ref):
        return v if v.dtype == ref.dtype else v.astype(ref.dtype)

    # ---- lin1 -> BN1 -> ReLU (bias b1 cancelled exactly by mean subtraction) ----
    h = jnp.dot(x, w1_ref[...], preferred_element_type=jnp.float32)
    h = bn_relu(h, g1_ref[...], beta1_ref[...])

    # ---- lin2 -> BN2 -> ReLU ----
    h2 = jnp.dot(cast(h, w2_ref), w2_ref[...], preferred_element_type=jnp.float32)
    feat = bn_relu(h2, g2_ref[...], beta2_ref[...])

    # ---- classifier (N padded to full 128-lane tiles -> unmasked stores) ----
    logits = jnp.dot(cast(feat, wc_ref), wc_ref[...],
                     preferred_element_type=jnp.float32) + bc_ref[...]

    feat_ref[...] = feat
    logits_ref[...] = logits


# Lazily probed: whether this JAX/Mosaic build accepts pl.Buffered(1) specs.
_SINGLE_BUFFER_WEIGHTS_OK = None


def mlp_forward(x, prepped, *, slice_outputs=True, episodes_per_step=None):
    """Forward pass matching the PyTorch module.

    x: (B, input_dim) for a single episode, or (E, B, input_dim) for E episodes
       (each episode gets its own BatchNorm batch statistics).
    prepped: output of prepare_params (padding/casting already done).
    Returns (logits, feature). With slice_outputs=False the lane-padded arrays
    are returned (avoids an extra HBM->HBM copy of the outputs).
    """
    squeeze = (x.ndim == 2)
    if squeeze:
        x = x[None]
    n_ep_total, batch, d_in = x.shape
    assert d_in == prepped["input_dim"]
    hp, cp = prepped["hp"], prepped["cp"]
    cdt = prepped["compute_dtype"]

    eb = episodes_per_step or _choose_episodes_per_step(n_ep_total, batch)
    n_steps = n_ep_total // eb
    rows = eb * batch
    x = x.astype(cdt).reshape(n_steps, rows, d_in)

    kernel = functools.partial(_mlp_kernel, eb, batch)
    weight_args = (prepped["w1"], prepped["g1"], prepped["beta1"],
                   prepped["w2"], prepped["g2"], prepped["beta2"],
                   prepped["wc"], prepped["bc"])

    def build_call(single_buffer):
        def wspec(shape):
            # Constant block index across the grid -> single buffer is enough.
            if single_buffer:
                return pl.BlockSpec(shape, lambda i: (0, 0),
                                    pipeline_mode=pl.Buffered(1))
            return pl.BlockSpec(shape, lambda i: (0, 0))

        return pl.pallas_call(
            kernel,
            grid=(n_steps,),
            in_specs=[
                pl.BlockSpec((None, rows, d_in), lambda i: (i, 0, 0)),  # x slab
                wspec((d_in, hp)), wspec((1, hp)), wspec((1, hp)),
                wspec((hp, hp)), wspec((1, hp)), wspec((1, hp)),
                wspec((hp, cp)), wspec((1, cp)),
            ],
            out_specs=(
                pl.BlockSpec((None, rows, cp), lambda i: (i, 0, 0)),
                pl.BlockSpec((None, rows, hp), lambda i: (i, 0, 0)),
            ),
            out_shape=(
                jax.ShapeDtypeStruct((n_steps, rows, cp), jnp.float32),
                jax.ShapeDtypeStruct((n_steps, rows, hp), jnp.float32),
            ),
            compiler_params=pltpu.CompilerParams(
                dimension_semantics=("parallel",),     # shards steps across TCs
                vmem_limit_bytes=32 * 1024 * 1024,     # explicit v7x-safe budget
            ),
        )

    global _SINGLE_BUFFER_WEIGHTS_OK
    attempts = ([True, False] if _SINGLE_BUFFER_WEIGHTS_OK is None
                else [_SINGLE_BUFFER_WEIGHTS_OK])
    last_err = None
    outs = None
    for use_sb in attempts:
        try:
            outs = build_call(use_sb)(x, *weight_args)
            _SINGLE_BUFFER_WEIGHTS_OK = bool(use_sb)
            last_err = None
            break
        except Exception as e:  # fall back to default double-buffering
            last_err = e
    if last_err is not None:
        raise last_err
    logits, feat = outs

    logits = logits.reshape(n_ep_total, batch, cp)
    feat = feat.reshape(n_ep_total, batch, hp)
    if slice_outputs:
        logits = logits[..., :prepped["ncls"]]
        feat = feat[..., :prepped["hid"]]
    if squeeze:
        logits, feat = logits[0], feat[0]
    return logits, feat


def init_params(key, input_dim, hid_dim, num_classes):
    """Deterministic synthetic init (shapes match the nn.Module)."""
    k1, k2, k3, k4, k5, k6 = jax.random.split(key, 6)

    def lin_init(kw, kb, fan_in, fan_out):
        bound = 1.0 / jnp.sqrt(fan_in)
        # stored as (in, out) so the kernel does x @ W + b
        w = jax.random.uniform(kw, (fan_in, fan_out), jnp.float32, -bound, bound)
        b = jax.random.uniform(kb, (1, fan_out), jnp.float32, -bound, bound)
        return w, b

    w1, b1 = lin_init(k1, k2, input_dim, hid_dim)
    w2, b2 = lin_init(k3, k4, hid_dim, hid_dim)
    wc, bc = lin_init(k5, k6, hid_dim, num_classes)
    return dict(
        w1=w1, b1=b1,
        g1=jnp.ones((1, hid_dim), jnp.float32), beta1=jnp.zeros((1, hid_dim), jnp.float32),
        w2=w2, b2=b2,
        g2=jnp.ones((1, hid_dim), jnp.float32), beta2=jnp.zeros((1, hid_dim), jnp.float32),
        wc=wc, bc=bc,
    )


def _reference(x, p):
    """Pure-JAX reference of the PyTorch forward (training-mode BN, with biases)."""
    def bn(h, g, b):
        mu = jnp.mean(h, axis=0, keepdims=True)
        var = jnp.mean((h - mu) ** 2, axis=0, keepdims=True)
        return (h - mu) / jnp.sqrt(var + BN_EPS) * g + b

    h = jnp.maximum(bn(x @ p["w1"] + p["b1"], p["g1"], p["beta1"]), 0.0)
    f = jnp.maximum(bn(h @ p["w2"] + p["b2"], p["g2"], p["beta2"]), 0.0)
    return f @ p["wc"] + p["bc"], f


if __name__ == "__main__":
    # Small shapes consistent with the module: episode batch of 8 examples.
    batch_size, input_dim, hid_dim, num_classes = 8, 16, 32, 4

    key = jax.random.PRNGKey(0)
    kx, kp, ke = jax.random.split(key, 3)
    params = init_params(kp, input_dim, hid_dim, num_classes)

    # Parameters padded / cast ONCE (hoisted out of the hot path).
    prepped_f32 = prepare_params(params, compute_dtype=jnp.float32)
    prepped_bf16 = prepare_params(params, compute_dtype=jnp.bfloat16)

    # --- single episode, f32 operands: exact-semantics check vs the module ---
    x = jax.random.normal(kx, (batch_size, input_dim), jnp.float32)
    logits, feat = mlp_forward(x, prepped_f32)
    jax.block_until_ready((logits, feat))

    ref_logits, ref_feat = _reference(x, params)
    assert logits.shape == (batch_size, num_classes)
    assert feat.shape == (batch_size, hid_dim)
    assert jnp.allclose(logits, ref_logits, atol=1e-4, rtol=1e-4)
    assert jnp.allclose(feat, ref_feat, atol=1e-4, rtol=1e-4)

    # --- many episodes packed into few grid steps, bf16 MXU operands ---
    n_ep = 32  # 32 episodes * 8 rows -> 256-row MXU tiles, 1 grid step
    xs = jax.random.normal(ke, (n_ep, batch_size, input_dim), jnp.float32)
    logits_b, feat_b = mlp_forward(xs, prepped_bf16)
    jax.block_until_ready((logits_b, feat_b))

    ref_lb, ref_fb = jax.vmap(lambda xe: _reference(xe, params))(xs)
    assert logits_b.shape == (n_ep, batch_size, num_classes)
    assert feat_b.shape == (n_ep, batch_size, hid_dim)
    # bf16 matmul operands (f32 accumulation / BN): loosened tolerance.
    assert jnp.allclose(logits_b, ref_lb, atol=1e-1, rtol=5e-2)
    assert jnp.allclose(feat_b, ref_fb, atol=1e-1, rtol=5e-2)

    # TODO(synk): nn.CrossEntropyLoss is defined in __init__ but never used in
    # forward, so it is intentionally not implemented in the kernel.
    print("KERNEL_OK")
</pallas_src>

<mosaic_0001>
module attributes {stable_mosaic.version = 11 : i64} {
  func.func @_mlp_kernel(%arg0: i32, %arg1: memref<1x8x16xf32, #tpu.memory_space<vmem>>, %arg2: memref<16x128xf32, #tpu.memory_space<vmem>>, %arg3: memref<1x128xf32, #tpu.memory_space<vmem>>, %arg4: memref<1x128xf32, #tpu.memory_space<vmem>>, %arg5: memref<128x128xf32, #tpu.memory_space<vmem>>, %arg6: memref<1x128xf32, #tpu.memory_space<vmem>>, %arg7: memref<1x128xf32, #tpu.memory_space<vmem>>, %arg8: memref<128x128xf32, #tpu.memory_space<vmem>>, %arg9: memref<1x128xf32, #tpu.memory_space<vmem>>, %arg10: memref<1x8x128xf32, #tpu.memory_space<vmem>>, %arg11: memref<1x8x128xf32, #tpu.memory_space<vmem>>) attributes {dimension_semantics = [#tpu.dimension_semantics<parallel>], iteration_bounds = array<i64: 1>, scalar_prefetch = 0 : i64, scratch_operands = 0 : i64, tpu.core_type = #tpu.core_type<tc>, window_params = [{transform_indices = @transform_0, window_bounds = array<i64: 1, 8, 16>}, {pipeline_mode = #tpu.pipeline_mode<synchronous>, transform_indices = @transform_1, window_bounds = array<i64: 16, 128>}, {pipeline_mode = #tpu.pipeline_mode<synchronous>, transform_indices = @transform_2, window_bounds = array<i64: 1, 128>}, {pipeline_mode = #tpu.pipeline_mode<synchronous>, transform_indices = @transform_3, window_bounds = array<i64: 1, 128>}, {pipeline_mode = #tpu.pipeline_mode<synchronous>, transform_indices = @transform_4, window_bounds = array<i64: 128, 128>}, {pipeline_mode = #tpu.pipeline_mode<synchronous>, transform_indices = @transform_5, window_bounds = array<i64: 1, 128>}, {pipeline_mode = #tpu.pipeline_mode<synchronous>, transform_indices = @transform_6, window_bounds = array<i64: 1, 128>}, {pipeline_mode = #tpu.pipeline_mode<synchronous>, transform_indices = @transform_7, window_bounds = array<i64: 128, 128>}, {pipeline_mode = #tpu.pipeline_mode<synchronous>, transform_indices = @transform_8, window_bounds = array<i64: 1, 128>}, {transform_indices = @transform_9, window_bounds = array<i64: 1, 8, 128>}, {transform_indices = @transform_10, window_bounds = array<i64: 1, 8, 128>}]} {
    %c0 = arith.constant 0 : index
    %c0_0 = arith.constant 0 : index
    %c0_1 = arith.constant 0 : index
    %0 = vector.load %arg1[%c0, %c0_0, %c0_1] : memref<1x8x16xf32, #tpu.memory_space<vmem>>, vector<1x8x16xf32>
    %1 = vector.shape_cast %0 : vector<1x8x16xf32> to vector<8x16xf32>
    %c0_2 = arith.constant 0 : index
    %c0_3 = arith.constant 0 : index
    %2 = vector.load %arg2[%c0_2, %c0_3] : memref<16x128xf32, #tpu.memory_space<vmem>>, vector<16x128xf32>
    %cst = arith.constant dense<0.000000e+00> : vector<8x128xf32>
    %3 = tpu.matmul %1, %2, %cst {dimension_numbers = #tpu.dot_dimension_numbers<[1], [0], [0], [1], [0, 0, 1, 1], [], []>} : vector<8x16xf32>, vector<16x128xf32>, vector<8x128xf32> -> vector<8x128xf32>
    %c0_4 = arith.constant 0 : index
    %c0_5 = arith.constant 0 : index
    %4 = vector.load %arg3[%c0_4, %c0_5] : memref<1x128xf32, #tpu.memory_space<vmem>>, vector<1x128xf32>
    %c0_6 = arith.constant 0 : index
    %c0_7 = arith.constant 0 : index
    %5 = vector.load %arg4[%c0_6, %c0_7] : memref<1x128xf32, #tpu.memory_space<vmem>>, vector<1x128xf32>
    %6 = vector.shape_cast %3 : vector<8x128xf32> to vector<1x8x128xf32>
    %cst_8 = arith.constant dense<0.000000e+00> : vector<1x128xf32>
    %7 = vector.multi_reduction <add>, %6, %cst_8 [1] : vector<1x8x128xf32> to vector<1x128xf32>
    %8 = vector.shape_cast %7 : vector<1x128xf32> to vector<1x1x128xf32>
    %cst_9 = arith.constant 8.000000e+00 : f32
    %9 = vector.broadcast %cst_9 : f32 to vector<1x1x128xf32>
    %10 = arith.divf %8, %9 : vector<1x1x128xf32>
    %11 = arith.mulf %6, %6 : vector<1x8x128xf32>
    %cst_10 = arith.constant dense<0.000000e+00> : vector<1x128xf32>
    %12 = vector.multi_reduction <add>, %11, %cst_10 [1] : vector<1x8x128xf32> to vector<1x128xf32>
    %13 = vector.shape_cast %12 : vector<1x128xf32> to vector<1x1x128xf32>
    %cst_11 = arith.constant 8.000000e+00 : f32
    %14 = vector.broadcast %cst_11 : f32 to vector<1x1x128xf32>
    %15 = arith.divf %13, %14 : vector<1x1x128xf32>
    %16 = arith.mulf %10, %10 : vector<1x1x128xf32>
    %17 = arith.subf %15, %16 : vector<1x1x128xf32>
    %cst_12 = arith.constant 0.000000e+00 : f32
    %18 = vector.broadcast %cst_12 : f32 to vector<1x1x128xf32>
    %19 = arith.maximumf %17, %18 : vector<1x1x128xf32>
    %cst_13 = arith.constant 9.99999974E-6 : f32
    %20 = vector.broadcast %cst_13 : f32 to vector<1x1x128xf32>
    %21 = arith.addf %19, %20 : vector<1x1x128xf32>
    %22 = math.rsqrt %21 : vector<1x1x128xf32>
    %23 = vector.shape_cast %4 : vector<1x128xf32> to vector<1x1x128xf32>
    %24 = arith.mulf %23, %22 : vector<1x1x128xf32>
    %25 = arith.mulf %10, %24 : vector<1x1x128xf32>
    %26 = vector.shape_cast %5 : vector<1x128xf32> to vector<1x1x128xf32>
    %27 = arith.subf %26, %25 : vector<1x1x128xf32>
    %28 = vector.broadcast %24 : vector<1x1x128xf32> to vector<1x8x128xf32>
    %29 = arith.mulf %6, %28 : vector<1x8x128xf32>
    %30 = vector.broadcast %27 : vector<1x1x128xf32> to vector<1x8x128xf32>
    %31 = arith.addf %29, %30 : vector<1x8x128xf32>
    %cst_14 = arith.constant 0.000000e+00 : f32
    %32 = vector.broadcast %cst_14 : f32 to vector<1x8x128xf32>
    %33 = arith.maximumf %31, %32 : vector<1x8x128xf32>
    %34 = vector.shape_cast %33 : vector<1x8x128xf32> to vector<8x128xf32>
    %c0_15 = arith.constant 0 : index
    %c0_16 = arith.constant 0 : index
    %35 = vector.load %arg5[%c0_15, %c0_16] : memref<128x128xf32, #tpu.memory_space<vmem>>, vector<128x128xf32>
    %cst_17 = arith.constant dense<0.000000e+00> : vector<8x128xf32>
    %36 = tpu.matmul %34, %35, %cst_17 {dimension_numbers = #tpu.dot_dimension_numbers<[1], [0], [0], [1], [0, 0, 1, 1], [], []>} : vector<8x128xf32>, vector<128x128xf32>, vector<8x128xf32> -> vector<8x128xf32>
    %c0_18 = arith.constant 0 : index
    %c0_19 = arith.constant 0 : index
    %37 = vector.load %arg6[%c0_18, %c0_19] : memref<1x128xf32, #tpu.memory_space<vmem>>, vector<1x128xf32>
    %c0_20 = arith.constant 0 : index
    %c0_21 = arith.constant 0 : index
    %38 = vector.load %arg7[%c0_20, %c0_21] : memref<1x128xf32, #tpu.memory_space<vmem>>, vector<1x128xf32>
    %39 = vector.shape_cast %36 : vector<8x128xf32> to vector<1x8x128xf32>
    %cst_22 = arith.constant dense<0.000000e+00> : vector<1x128xf32>
    %40 = vector.multi_reduction <add>, %39, %cst_22 [1] : vector<1x8x128xf32> to vector<1x128xf32>
    %41 = vector.shape_cast %40 : vector<1x128xf32> to vector<1x1x128xf32>
    %cst_23 = arith.constant 8.000000e+00 : f32
    %42 = vector.broadcast %cst_23 : f32 to vector<1x1x128xf32>
    %43 = arith.divf %41, %42 : vector<1x1x128xf32>
    %44 = arith.mulf %39, %39 : vector<1x8x128xf32>
    %cst_24 = arith.constant dense<0.000000e+00> : vector<1x128xf32>
    %45 = vector.multi_reduction <add>, %44, %cst_24 [1] : vector<1x8x128xf32> to vector<1x128xf32>
    %46 = vector.shape_cast %45 : vector<1x128xf32> to vector<1x1x128xf32>
    %cst_25 = arith.constant 8.000000e+00 : f32
    %47 = vector.broadcast %cst_25 : f32 to vector<1x1x128xf32>
    %48 = arith.divf %46, %47 : vector<1x1x128xf32>
    %49 = arith.mulf %43, %43 : vector<1x1x128xf32>
    %50 = arith.subf %48, %49 : vector<1x1x128xf32>
    %cst_26 = arith.constant 0.000000e+00 : f32
    %51 = vector.broadcast %cst_26 : f32 to vector<1x1x128xf32>
    %52 = arith.maximumf %50, %51 : vector<1x1x128xf32>
    %cst_27 = arith.constant 9.99999974E-6 : f32
    %53 = vector.broadcast %cst_27 : f32 to vector<1x1x128xf32>
    %54 = arith.addf %52, %53 : vector<1x1x128xf32>
    %55 = math.rsqrt %54 : vector<1x1x128xf32>
    %56 = vector.shape_cast %37 : vector<1x128xf32> to vector<1x1x128xf32>
    %57 = arith.mulf %56, %55 : vector<1x1x128xf32>
    %58 = arith.mulf %43, %57 : vector<1x1x128xf32>
    %59 = vector.shape_cast %38 : vector<1x128xf32> to vector<1x1x128xf32>
    %60 = arith.subf %59, %58 : vector<1x1x128xf32>
    %61 = vector.broadcast %57 : vector<1x1x128xf32> to vector<1x8x128xf32>
    %62 = arith.mulf %39, %61 : vector<1x8x128xf32>
    %63 = vector.broadcast %60 : vector<1x1x128xf32> to vector<1x8x128xf32>
    %64 = arith.addf %62, %63 : vector<1x8x128xf32>
    %cst_28 = arith.constant 0.000000e+00 : f32
    %65 = vector.broadcast %cst_28 : f32 to vector<1x8x128xf32>
    %66 = arith.maximumf %64, %65 : vector<1x8x128xf32>
    %67 = vector.shape_cast %66 : vector<1x8x128xf32> to vector<8x128xf32>
    %c0_29 = arith.constant 0 : index
    %c0_30 = arith.constant 0 : index
    %68 = vector.load %arg8[%c0_29, %c0_30] : memref<128x128xf32, #tpu.memory_space<vmem>>, vector<128x128xf32>
    %cst_31 = arith.constant dense<0.000000e+00> : vector<8x128xf32>
    %69 = tpu.matmul %67, %68, %cst_31 {dimension_numbers = #tpu.dot_dimension_numbers<[1], [0], [0], [1], [0, 0, 1, 1], [], []>} : vector<8x128xf32>, vector<128x128xf32>, vector<8x128xf32> -> vector<8x128xf32>
    %c0_32 = arith.constant 0 : index
    %c0_33 = arith.constant 0 : index
    %70 = vector.load %arg9[%c0_32, %c0_33] : memref<1x128xf32, #tpu.memory_space<vmem>>, vector<1x128xf32>
    %71 = vector.broadcast %70 : vector<1x128xf32> to vector<8x128xf32>
    %72 = arith.addf %69, %71 : vector<8x128xf32>
    %c0_34 = arith.constant 0 : index
    %c0_35 = arith.constant 0 : index
    %c0_36 = arith.constant 0 : index
    %73 = vector.load %arg11[%c0_34, %c0_35, %c0_36] : memref<1x8x128xf32, #tpu.memory_space<vmem>>, vector<1x8x128xf32>
    %74 = vector.shape_cast %73 : vector<1x8x128xf32> to vector<8x128xf32>
    %75 = vector.shape_cast %67 : vector<8x128xf32> to vector<1x8x128xf32>
    tpu.vector_store %arg11[%c0_34, %c0_35, %c0_36], %75 {strides = array<i32>} : memref<1x8x128xf32, #tpu.memory_space<vmem>>, vector<1x8x128xf32>,
    %c0_37 = arith.constant 0 : index
    %c0_38 = arith.constant 0 : index
    %c0_39 = arith.constant 0 : index
    %76 = vector.load %arg10[%c0_37, %c0_38, %c0_39] : memref<1x8x128xf32, #tpu.memory_space<vmem>>, vector<1x8x128xf32>
    %77 = vector.shape_cast %76 : vector<1x8x128xf32> to vector<8x128xf32>
    %78 = vector.shape_cast %72 : vector<8x128xf32> to vector<1x8x128xf32>
    tpu.vector_store %arg10[%c0_37, %c0_38, %c0_39], %78 {strides = array<i32>} : memref<1x8x128xf32, #tpu.memory_space<vmem>>, vector<1x8x128xf32>,
    return
  }
  func.func @transform_0(%arg0: i32) -> (i32, i32, i32) {
    %c0_i32 = arith.constant 0 : i32
    %c0_i32_0 = arith.constant 0 : i32
    %c0_i32_1 = arith.constant 0 : i32
    return %arg0, %c0_i32, %c0_i32_0 : i32, i32, i32
  }
  func.func @transform_1(%arg0: i32) -> (i32, i32) {
    %c0_i32 = arith.constant 0 : i32
    %c0_i32_0 = arith.constant 0 : i32
    %c0_i32_1 = arith.constant 0 : i32
    return %c0_i32, %c0_i32_0 : i32, i32
  }
  func.func @transform_2(%arg0: i32) -> (i32, i32) {
    %c0_i32 = arith.constant 0 : i32
    %c0_i32_0 = arith.constant 0 : i32
    %c0_i32_1 = arith.constant 0 : i32
    return %c0_i32, %c0_i32_0 : i32, i32
  }
  func.func @transform_3(%arg0: i32) -> (i32, i32) {
    %c0_i32 = arith.constant 0 : i32
    %c0_i32_0 = arith.constant 0 : i32
    %c0_i32_1 = arith.constant 0 : i32
    return %c0_i32, %c0_i32_0 : i32, i32
  }
  func.func @transform_4(%arg0: i32) -> (i32, i32) {
    %c0_i32 = arith.constant 0 : i32
    %c0_i32_0 = arith.constant 0 : i32
    %c0_i32_1 = arith.constant 0 : i32
    return %c0_i32, %c0_i32_0 : i32, i32
  }
  func.func @transform_5(%arg0: i32) -> (i32, i32) {
    %c0_i32 = arith.constant 0 : i32
    %c0_i32_0 = arith.constant 0 : i32
    %c0_i32_1 = arith.constant 0 : i32
    return %c0_i32, %c0_i32_0 : i32, i32
  }
  func.func @transform_6(%arg0: i32) -> (i32, i32) {
    %c0_i32 = arith.constant 0 : i32
    %c0_i32_0 = arith.constant 0 : i32
    %c0_i32_1 = arith.constant 0 : i32
    return %c0_i32, %c0_i32_0 : i32, i32
  }
  func.func @transform_7(%arg0: i32) -> (i32, i32) {
    %c0_i32 = arith.constant 0 : i32
    %c0_i32_0 = arith.constant 0 : i32
    %c0_i32_1 = arith.constant 0 : i32
    return %c0_i32, %c0_i32_0 : i32, i32
  }
  func.func @transform_8(%arg0: i32) -> (i32, i32) {
    %c0_i32 = arith.constant 0 : i32
    %c0_i32_0 = arith.constant 0 : i32
    %c0_i32_1 = arith.constant 0 : i32
    return %c0_i32, %c0_i32_0 : i32, i32
  }
  func.func @transform_9(%arg0: i32) -> (i32, i32, i32) {
    %c0_i32 = arith.constant 0 : i32
    %c0_i32_0 = arith.constant 0 : i32
    %c0_i32_1 = arith.constant 0 : i32
    return %arg0, %c0_i32, %c0_i32_0 : i32, i32, i32
  }
  func.func @transform_10(%arg0: i32) -> (i32, i32, i32) {
    %c0_i32 = arith.constant 0 : i32
    %c0_i32_0 = arith.constant 0 : i32
    %c0_i32_1 = arith.constant 0 : i32
    return %arg0, %c0_i32, %c0_i32_0 : i32, i32, i32
  }
}

module attributes {stable_mosaic.version = 11 : i64} {
  func.func @_mlp_kernel(%arg0: i32, %arg1: memref<1x8x16xf32, #tpu.memory_space<vmem>>, %arg2: memref<16x128xf32, #tpu.memory_space<vmem>>, %arg3: memref<1x128xf32, #tpu.memory_space<vmem>>, %arg4: memref<1x128xf32, #tpu.memory_space<vmem>>, %arg5: memref<128x128xf32, #tpu.memory_space<vmem>>, %arg6: memref<1x128xf32, #tpu.memory_space<vmem>>, %arg7: memref<1x128xf32, #tpu.memory_space<vmem>>, %arg8: memref<128x128xf32, #tpu.memory_space<vmem>>, %arg9: memref<1x128xf32, #tpu.memory_space<vmem>>, %arg10: memref<1x8x128xf32, #tpu.memory_space<vmem>>, %arg11: memref<1x8x128xf32, #tpu.memory_space<vmem>>) attributes {dimension_semantics = [#tpu.dimension_semantics<parallel>], iteration_bounds = array<i64: 1>, scalar_prefetch = 0 : i64, scratch_operands = 0 : i64, tpu.core_type = #tpu.core_type<tc>, window_params = [{transform_indices = @transform_0, window_bounds = array<i64: 1, 8, 16>}, {pipeline_mode = #tpu.pipeline_mode<synchronous>, transform_indices = @transform_1, window_bounds = array<i64: 16, 128>}, {pipeline_mode = #tpu.pipeline_mode<synchronous>, transform_indices = @transform_2, window_bounds = array<i64: 1, 128>}, {pipeline_mode = #tpu.pipeline_mode<synchronous>, transform_indices = @transform_3, window_bounds = array<i64: 1, 128>}, {pipeline_mode = #tpu.pipeline_mode<synchronous>, transform_indices = @transform_4, window_bounds = array<i64: 128, 128>}, {pipeline_mode = #tpu.pipeline_mode<synchronous>, transform_indices = @transform_5, window_bounds = array<i64: 1, 128>}, {pipeline_mode = #tpu.pipeline_mode<synchronous>, transform_indices = @transform_6, window_bounds = array<i64: 1, 128>}, {pipeline_mode = #tpu.pipeline_mode<synchronous>, transform_indices = @transform_7, window_bounds = array<i64: 128, 128>}, {pipeline_mode = #tpu.pipeline_mode<synchronous>, transform_indices = @transform_8, window_bounds = array<i64: 1, 128>}, {transform_indices = @transform_9, window_bounds = array<i64: 1, 8, 128>}, {transform_indices = @transform_10, window_bounds = array<i64: 1, 8, 128>}]} {
    %c0 = arith.constant 0 : index
    %c0_0 = arith.constant 0 : index
    %c0_1 = arith.constant 0 : index
    %0 = vector.load %arg1[%c0, %c0_0, %c0_1] : memref<1x8x16xf32, #tpu.memory_space<vmem>>, vector<1x8x16xf32>
    %1 = vector.shape_cast %0 : vector<1x8x16xf32> to vector<8x16xf32>
    %c0_2 = arith.constant 0 : index
    %c0_3 = arith.constant 0 : index
    %2 = vector.load %arg2[%c0_2, %c0_3] : memref<16x128xf32, #tpu.memory_space<vmem>>, vector<16x128xf32>
    %cst = arith.constant dense<0.000000e+00> : vector<8x128xf32>
    %3 = tpu.matmul %1, %2, %cst {dimension_numbers = #tpu.dot_dimension_numbers<[1], [0], [0], [1], [0, 0, 1, 1], [], []>} : vector<8x16xf32>, vector<16x128xf32>, vector<8x128xf32> -> vector<8x128xf32>
    %c0_4 = arith.constant 0 : index
    %c0_5 = arith.constant 0 : index
    %4 = vector.load %arg3[%c0_4, %c0_5] : memref<1x128xf32, #tpu.memory_space<vmem>>, vector<1x128xf32>
    %c0_6 = arith.constant 0 : index
    %c0_7 = arith.constant 0 : index
    %5 = vector.load %arg4[%c0_6, %c0_7] : memref<1x128xf32, #tpu.memory_space<vmem>>, vector<1x128xf32>
    %6 = vector.shape_cast %3 : vector<8x128xf32> to vector<1x8x128xf32>
    %cst_8 = arith.constant dense<0.000000e+00> : vector<1x128xf32>
    %7 = vector.multi_reduction <add>, %6, %cst_8 [1] : vector<1x8x128xf32> to vector<1x128xf32>
    %8 = vector.shape_cast %7 : vector<1x128xf32> to vector<1x1x128xf32>
    %cst_9 = arith.constant 8.000000e+00 : f32
    %9 = vector.broadcast %cst_9 : f32 to vector<1x1x128xf32>
    %10 = arith.divf %8, %9 : vector<1x1x128xf32>
    %11 = arith.mulf %6, %6 : vector<1x8x128xf32>
    %cst_10 = arith.constant dense<0.000000e+00> : vector<1x128xf32>
    %12 = vector.multi_reduction <add>, %11, %cst_10 [1] : vector<1x8x128xf32> to vector<1x128xf32>
    %13 = vector.shape_cast %12 : vector<1x128xf32> to vector<1x1x128xf32>
    %cst_11 = arith.constant 8.000000e+00 : f32
    %14 = vector.broadcast %cst_11 : f32 to vector<1x1x128xf32>
    %15 = arith.divf %13, %14 : vector<1x1x128xf32>
    %16 = arith.mulf %10, %10 : vector<1x1x128xf32>
    %17 = arith.subf %15, %16 : vector<1x1x128xf32>
    %cst_12 = arith.constant 0.000000e+00 : f32
    %18 = vector.broadcast %cst_12 : f32 to vector<1x1x128xf32>
    %19 = arith.maximumf %17, %18 : vector<1x1x128xf32>
    %cst_13 = arith.constant 9.99999974E-6 : f32
    %20 = vector.broadcast %cst_13 : f32 to vector<1x1x128xf32>
    %21 = arith.addf %19, %20 : vector<1x1x128xf32>
    %22 = math.rsqrt %21 : vector<1x1x128xf32>
    %23 = vector.shape_cast %4 : vector<1x128xf32> to vector<1x1x128xf32>
    %24 = arith.mulf %23, %22 : vector<1x1x128xf32>
    %25 = arith.mulf %10, %24 : vector<1x1x128xf32>
    %26 = vector.shape_cast %5 : vector<1x128xf32> to vector<1x1x128xf32>
    %27 = arith.subf %26, %25 : vector<1x1x128xf32>
    %28 = vector.broadcast %24 : vector<1x1x128xf32> to vector<1x8x128xf32>
    %29 = arith.mulf %6, %28 : vector<1x8x128xf32>
    %30 = vector.broadcast %27 : vector<1x1x128xf32> to vector<1x8x128xf32>
    %31 = arith.addf %29, %30 : vector<1x8x128xf32>
    %cst_14 = arith.constant 0.000000e+00 : f32
    %32 = vector.broadcast %cst_14 : f32 to vector<1x8x128xf32>
    %33 = arith.maximumf %31, %32 : vector<1x8x128xf32>
    %34 = vector.shape_cast %33 : vector<1x8x128xf32> to vector<8x128xf32>
    %c0_15 = arith.constant 0 : index
    %c0_16 = arith.constant 0 : index
    %35 = vector.load %arg5[%c0_15, %c0_16] : memref<128x128xf32, #tpu.memory_space<vmem>>, vector<128x128xf32>
    %cst_17 = arith.constant dense<0.000000e+00> : vector<8x128xf32>
    %36 = tpu.matmul %34, %35, %cst_17 {dimension_numbers = #tpu.dot_dimension_numbers<[1], [0], [0], [1], [0, 0, 1, 1], [], []>} : vector<8x128xf32>, vector<128x128xf32>, vector<8x128xf32> -> vector<8x128xf32>
    %c0_18 = arith.constant 0 : index
    %c0_19 = arith.constant 0 : index
    %37 = vector.load %arg6[%c0_18, %c0_19] : memref<1x128xf32, #tpu.memory_space<vmem>>, vector<1x128xf32>
    %c0_20 = arith.constant 0 : index
    %c0_21 = arith.constant 0 : index
    %38 = vector.load %arg7[%c0_20, %c0_21] : memref<1x128xf32, #tpu.memory_space<vmem>>, vector<1x128xf32>
    %39 = vector.shape_cast %36 : vector<8x128xf32> to vector<1x8x128xf32>
    %cst_22 = arith.constant dense<0.000000e+00> : vector<1x128xf32>
    %40 = vector.multi_reduction <add>, %39, %cst_22 [1] : vector<1x8x128xf32> to vector<1x128xf32>
    %41 = vector.shape_cast %40 : vector<1x128xf32> to vector<1x1x128xf32>
    %cst_23 = arith.constant 8.000000e+00 : f32
    %42 = vector.broadcast %cst_23 : f32 to vector<1x1x128xf32>
    %43 = arith.divf %41, %42 : vector<1x1x128xf32>
    %44 = arith.mulf %39, %39 : vector<1x8x128xf32>
    %cst_24 = arith.constant dense<0.000000e+00> : vector<1x128xf32>
    %45 = vector.multi_reduction <add>, %44, %cst_24 [1] : vector<1x8x128xf32> to vector<1x128xf32>
    %46 = vector.shape_cast %45 : vector<1x128xf32> to vector<1x1x128xf32>
    %cst_25 = arith.constant 8.000000e+00 : f32
    %47 = vector.broadcast %cst_25 : f32 to vector<1x1x128xf32>
    %48 = arith.divf %46, %47 : vector<1x1x128xf32>
    %49 = arith.mulf %43, %43 : vector<1x1x128xf32>
    %50 = arith.subf %48, %49 : vector<1x1x128xf32>
    %cst_26 = arith.constant 0.000000e+00 : f32
    %51 = vector.broadcast %cst_26 : f32 to vector<1x1x128xf32>
    %52 = arith.maximumf %50, %51 : vector<1x1x128xf32>
    %cst_27 = arith.constant 9.99999974E-6 : f32
    %53 = vector.broadcast %cst_27 : f32 to vector<1x1x128xf32>
    %54 = arith.addf %52, %53 : vector<1x1x128xf32>
    %55 = math.rsqrt %54 : vector<1x1x128xf32>
    %56 = vector.shape_cast %37 : vector<1x128xf32> to vector<1x1x128xf32>
    %57 = arith.mulf %56, %55 : vector<1x1x128xf32>
    %58 = arith.mulf %43, %57 : vector<1x1x128xf32>
    %59 = vector.shape_cast %38 : vector<1x128xf32> to vector<1x1x128xf32>
    %60 = arith.subf %59, %58 : vector<1x1x128xf32>
    %61 = vector.broadcast %57 : vector<1x1x128xf32> to vector<1x8x128xf32>
    %62 = arith.mulf %39, %61 : vector<1x8x128xf32>
    %63 = vector.broadcast %60 : vector<1x1x128xf32> to vector<1x8x128xf32>
    %64 = arith.addf %62, %63 : vector<1x8x128xf32>
    %cst_28 = arith.constant 0.000000e+00 : f32
    %65 = vector.broadcast %cst_28 : f32 to vector<1x8x128xf32>
    %66 = arith.maximumf %64, %65 : vector<1x8x128xf32>
    %67 = vector.shape_cast %66 : vector<1x8x128xf32> to vector<8x128xf32>
    %c0_29 = arith.constant 0 : index
    %c0_30 = arith.constant 0 : index
    %68 = vector.load %arg8[%c0_29, %c0_30] : memref<128x128xf32, #tpu.memory_space<vmem>>, vector<128x128xf32>
    %cst_31 = arith.constant dense<0.000000e+00> : vector<8x128xf32>
    %69 = tpu.matmul %67, %68, %cst_31 {dimension_numbers = #tpu.dot_dimension_numbers<[1], [0], [0], [1], [0, 0, 1, 1], [], []>} : vector<8x128xf32>, vector<128x128xf32>, vector<8x128xf32> -> vector<8x128xf32>
    %c0_32 = arith.constant 0 : index
    %c0_33 = arith.constant 0 : index
    %70 = vector.load %arg9[%c0_32, %c0_33] : memref<1x128xf32, #tpu.memory_space<vmem>>, vector<1x128xf32>
    %71 = vector.broadcast %70 : vector<1x128xf32> to vector<8x128xf32>
    %72 = arith.addf %69, %71 : vector<8x128xf32>
    %c0_34 = arith.constant 0 : index
    %c0_35 = arith.constant 0 : index
    %c0_36 = arith.constant 0 : index
    %73 = vector.load %arg11[%c0_34, %c0_35, %c0_36] : memref<1x8x128xf32, #tpu.memory_space<vmem>>, vector<1x8x128xf32>
    %74 = vector.shape_cast %73 : vector<1x8x128xf32> to vector<8x128xf32>
    %75 = vector.shape_cast %67 : vector<8x128xf32> to vector<1x8x128xf32>
    tpu.vector_store %arg11[%c0_34, %c0_35, %c0_36], %75 {strides = array<i32>} : memref<1x8x128xf32, #tpu.memory_space<vmem>>, vector<1x8x128xf32>,
    %c0_37 = arith.constant 0 : index
    %c0_38 = arith.constant 0 : index
    %c0_39 = arith.constant 0 : index
    %76 = vector.load %arg10[%c0_37, %c0_38, %c0_39] : memref<1x8x128xf32, #tpu.memory_space<vmem>>, vector<1x8x128xf32>
    %77 = vector.shape_cast %76 : vector<1x8x128xf32> to vector<8x128xf32>
    %78 = vector.shape_cast %72 : vector<8x128xf32> to vector<1x8x128xf32>
    tpu.vector_store %arg10[%c0_37, %c0_38, %c0_39], %78 {strides = array<i32>} : memref<1x8x128xf32, #tpu.memory_space<vmem>>, vector<1x8x128xf32>,
    return
  }
  func.func @transform_0(%arg0: i32) -> (i32, i32, i32) {
    %c0_i32 = arith.constant 0 : i32
    %c0_i32_0 = arith.constant 0 : i32
    %c0_i32_1 = arith.constant 0 : i32
    return %arg0, %c0_i32, %c0_i32_0 : i32, i32, i32
  }
  func.func @transform_1(%arg0: i32) -> (i32, i32) {
    %c0_i32 = arith.constant 0 : i32
    %c0_i32_0 = arith.constant 0 : i32
    %c0_i32_1 = arith.constant 0 : i32
    return %c0_i32, %c0_i32_0 : i32, i32
  }
  func.func @transform_2(%arg0: i32) -> (i32, i32) {
    %c0_i32 = arith.constant 0 : i32
    %c0_i32_0 = arith.constant 0 : i32
    %c0_i32_1 = arith.constant 0 : i32
    return %c0_i32, %c0_i32_0 : i32, i32
  }
  func.func @transform_3(%arg0: i32) -> (i32, i32) {
    %c0_i32 = arith.constant 0 : i32
    %c0_i32_0 = arith.constant 0 : i32
    %c0_i32_1 = arith.constant 0 : i32
    return %c0_i32, %c0_i32_0 : i32, i32
  }
  func.func @transform_4(%arg0: i32) -> (i32, i32) {
    %c0_i32 = arith.constant 0 : i32
    %c0_i32_0 = arith.constant 0 : i32
    %c0_i32_1 = arith.constant 0 : i32
    return %c0_i32, %c0_i32_0 : i32, i32
  }
  func.func @transform_5(%arg0: i32) -> (i32, i32) {
    %c0_i32 = arith.constant 0 : i32
    %c0_i32_0 = arith.constant 0 : i32
    %c0_i32_1 = arith.constant 0 : i32
    return %c0_i32, %c0_i32_0 : i32, i32
  }
  func.func @transform_6(%arg0: i32) -> (i32, i32) {
    %c0_i32 = arith.constant 0 : i32
    %c0_i32_0 = arith.constant 0 : i32
    %c0_i32_1 = arith.constant 0 : i32
    return %c0_i32, %c0_i32_0 : i32, i32
  }
  func.func @transform_7(%arg0: i32) -> (i32, i32) {
    %c0_i32 = arith.constant 0 : i32
    %c0_i32_0 = arith.constant 0 : i32
    %c0_i32_1 = arith.constant 0 : i32
    return %c0_i32, %c0_i32_0 : i32, i32
  }
  func.func @transform_8(%arg0: i32) -> (i32, i32) {
    %c0_i32 = arith.constant 0 : i32
    %c0_i32_0 = arith.constant 0 : i32
    %c0_i32_1 = arith.constant 0 : i32
    return %c0_i32, %c0_i32_0 : i32, i32
  }
  func.func @transform_9(%arg0: i32) -> (i32, i32, i32) {
    %c0_i32 = arith.constant 0 : i32
    %c0_i32_0 = arith.constant 0 : i32
    %c0_i32_1 = arith.constant 0 : i32
    return %arg0, %c0_i32, %c0_i32_0 : i32, i32, i32
  }
  func.func @transform_10(%arg0: i32) -> (i32, i32, i32) {
    %c0_i32 = arith.constant 0 : i32
    %c0_i32_0 = arith.constant 0 : i32
    %c0_i32_1 = arith.constant 0 : i32
    return %arg0, %c0_i32, %c0_i32_0 : i32, i32, i32
  }
}

</mosaic_0001>

<bundles_post_ra>
// kernel: tpu_custom_call.1
= control target key start
LH: loop header
LB: loop body
LE: loop exit
PB: predicated region body
PF: predicated region fallthrough
CT: control target
= control target key end

     0   :  { %16 = vsyncpa [#allocation3], 0  ;;  %s968_s0 = inlined_call_operand.hbm [shape: f32[1,8,16], index: 0, kind: input, shape index: {}]   ;;  %s969_s1 = inlined_call_operand.hbm [shape: f32[16,128], index: 1, kind: input, shape index: {}]   ;;  %s970_s2 = inlined_call_operand.vmem [shape: f32[1,128], index: 2, kind: input, shape index: {}]   ;;  %s971_s3 = inlined_call_operand.vmem [shape: f32[1,128], index: 3, kind: input, shape index: {}]   ;;  %s972_s4 = inlined_call_operand.hbm [shape: f32[128,128], index: 4, kind: input, shape index: {}]   ;;  %s973_s5 = inlined_call_operand.vmem [shape: f32[1,128], index: 5, kind: input, shape index: {}]   ;;  %s974_s6 = inlined_call_operand.vmem [shape: f32[1,128], index: 6, kind: input, shape index: {}]   ;;  %s975_s7 = inlined_call_operand.hbm [shape: f32[128,128], index: 7, kind: input, shape index: {}]   ;;  %s976_s8 = inlined_call_operand.vmem [shape: f32[1,128], index: 8, kind: input, shape index: {}]   ;;  %s977_s9 = inlined_call_operand.hbm [shape: f32[1,8,128], index: 9, kind: output, shape index: {0}]   ;;  %s978_s10 = inlined_call_operand.hbm [shape: f32[1,8,128], index: 10, kind: output, shape index: {1}]  }
   0x1   :  { %17 = vsyncpa [#allocation6], 0 }
   0x2   :  { %18 = vsyncpa [#allocation9], 0 }
   0x3   :  { %19 = vsyncpa [#allocation4], 0 }
   0x4   :  { %20 = vsyncpa [#allocation12], 0  ;;  %s783_s13 = smov [#allocation5]   ;;  %s641_s17 = scalar_lea.hbm %s969_s1, 256 }
   0x5   :  { %s36_s14 = sshll.u32 %s783_s13, 4  ;;  %p642_p0 = scmp.ne.s32.totalorder %s969_s1, %s641_s17  ;;  %s37_s14 = int_to_ptr.vmem [resolvable:$true] %s36_s14 }
   0x6   :  { %p645_p1 = scmp.lt.u32.totalorder %s641_s17, %s969_s1 }
   0x8   :  { %p647_p2 = pnand %p645_p1, %p642_p0 }
   0xa   :  { %650 = shalt.err (!%p647_p2)
}
   0xb   :  { %s651_s22 = scalar_lea.vmem %s37_s14, 256  ;;  %p656_p4 = scmp.lt.s32.totalorder %s37_s14, %s37_s14 }
   0xc   :  { %p652_p3 = scmp.ne.s32.totalorder %s37_s14, %s651_s22  ;;  %p657_p5 = scmp.lt.s32.totalorder %s651_s22, %s651_s22 }
   0xe   :  { %p658_p6 = por %p657_p5, %p656_p4 }
  0x10   :  { %p659_p7 = pnand %p658_p6, %p652_p3 }
  0x12   :  { %662 = shalt.err (!%p659_p7)
}
  0x13   :  { %s784_s23 = smov 128   ;;  %s785_s24 = smov 8  }
  0x14   :  { %42 = dma.hbm_to_vmem [thread:$0]  %s969_s1, 256, %s37_s14, [#allocation6], %s784_s23, %s784_s23, %s785_s24  }
  0x15   :  { %s786_s27 = smov [#allocation2]   ;;  %s787_s29 = smov [#allocation7]  }
  0x16   :  { %s27_s28 = sshll.u32 %s786_s27, 4  ;;  %s52_s30 = sshll.u32 %s787_s29, 4  ;;  %s28_s28 = int_to_ptr.vmem [resolvable:$true] %s27_s28  ;;  %s53_s30 = int_to_ptr.vmem [resolvable:$true] %s52_s30 }
  0x17   :  { %s663_s13 = scalar_lea.hbm %s968_s0, 128 }
  0x18   :  { %p664_p8 = scmp.ne.s32.totalorder %s968_s0, %s663_s13  ;;  %p667_p9 = scmp.lt.u32.totalorder %s663_s13, %s968_s0 }
  0x1a   :  { %p669_p10 = pnand %p667_p9, %p664_p8 }
  0x1c   :  { %672 = shalt.err (!%p669_p10)
}
  0x1d   :  { %s673_s1 = scalar_lea.vmem %s28_s28, 128  ;;  %p678_p12 = scmp.lt.s32.totalorder %s28_s28, %s28_s28 }
  0x1e   :  { %p674_p11 = scmp.ne.s32.totalorder %s28_s28, %s673_s1  ;;  %p679_p13 = scmp.lt.s32.totalorder %s673_s1, %s673_s1 }
  0x20   :  { %p680_p0 = por %p679_p13, %p678_p12 }
  0x22   :  { %p681_p1 = pnand %p680_p0, %p674_p11 }
  0x24   :  { %684 = shalt.err (!%p681_p1)
}
  0x25   :  { %30 = dma.hbm_to_vmem [thread:$0]  %s968_s0, 128, %s28_s28, [#allocation3]  }
  0x26   :  { %s685_s22 = scalar_lea.hbm %s972_s4, 2048 }
  0x27   :  { %p686_p2 = scmp.ne.s32.totalorder %s972_s4, %s685_s22  ;;  %p689_p3 = scmp.lt.u32.totalorder %s685_s22, %s972_s4 }
  0x29   :  { %p691_p4 = pnand %p689_p3, %p686_p2 }
  0x2b   :  { %694 = shalt.err (!%p691_p4)
}
  0x2c   :  { %s695_s11 = scalar_lea.vmem %s53_s30, 2048  ;;  %p700_p6 = scmp.lt.s32.totalorder %s53_s30, %s53_s30 }
  0x2d   :  { %p696_p5 = scmp.ne.s32.totalorder %s53_s30, %s695_s11  ;;  %p701_p7 = scmp.lt.s32.totalorder %s695_s11, %s695_s11 }
  0x2f   :  { %p702_p8 = por %p701_p7, %p700_p6 }
  0x31   :  { %p703_p9 = pnand %p702_p8, %p696_p5 }
  0x33   :  { %706 = shalt.err (!%p703_p9)
}
  0x34   :  { %58 = dma.hbm_to_vmem [thread:$0]  %s972_s4, 2048, %s53_s30, [#allocation6], %s784_s23, %s784_s23, %s785_s24  }
  0x35   :  { %s788_s12 = smov [#allocation8]   ;;  %s707_s17 = scalar_lea.hbm %s975_s7, 2048 }
  0x36   :  { %s68_s13 = sshll.u32 %s788_s12, 4  ;;  %p708_p10 = scmp.ne.s32.totalorder %s975_s7, %s707_s17  ;;  %s69_s13 = int_to_ptr.vmem [resolvable:$true] %s68_s13 }
  0x37   :  { %p711_p11 = scmp.lt.u32.totalorder %s707_s17, %s975_s7 }
  0x39   :  { %p713_p12 = pnand %p711_p11, %p708_p10 }
  0x3b   :  { %716 = shalt.err (!%p713_p12)
}
  0x3c   :  { %s717_s20 = scalar_lea.vmem %s69_s13, 2048  ;;  %p722_p0 = scmp.lt.s32.totalorder %s69_s13, %s69_s13 }
  0x3d   :  { %p718_p13 = scmp.ne.s32.totalorder %s69_s13, %s717_s20  ;;  %p723_p1 = scmp.lt.s32.totalorder %s717_s20, %s717_s20 }
  0x3f   :  { %p724_p2 = por %p723_p1, %p722_p0 }
  0x41   :  { %p725_p3 = pnand %p724_p2, %p718_p13 }
  0x43   :  { %728 = shalt.err (!%p725_p3)
}
  0x44   :  { %74 = dma.hbm_to_vmem [thread:$0]  %s975_s7, 2048, %s69_s13, [#allocation9], %s784_s23, %s784_s23, %s785_s24  }
  0x45   :  { %773 = dma.done.wait [#allocation3], 128  }
  0x46   :  { %774 = vsyncadd [#allocation3], 4294967168 }
  0x47   :  { %775 = dma.done.wait [#allocation6], 2304  }
  0x48   :  { %776 = vsyncadd [#allocation6], 4294964992 }
  0x49   :  { %777 = dma.done.wait [#allocation9], 2048  }
  0x4a   :  { %778 = vsyncadd [#allocation9], 4294965248  ;;  %v789_v0 = vmov 0.0|0.0   ;;  %vm790_vm0 = vmmov 0   ;;  %v791_v1 = vmov 0.0   ;;  %v90_v2 = vld [vmem:[#allocation5] sm:$0xff]  ;;  %v193_v51 = vlaneseq }
  0x4b   :  { %575 = vmatprep.subr.bf16.mxu0 %v789_v0  ;;  %502 = vmatprep.mubr.msk.f32.mxu0 %vm790_vm0, %v791_v1  ;;  %v91_v3 = vld [vmem:[#allocation5 + $0x8] sm:$0xff]  ;;  %v89_v5 = vld [vmem:[#allocation2] sm:$0xff]  ;;  %vm92_vm1 = vcmask 130048   ;;  %v207_v6 = vld [vmem:[#allocation7] sm:$0xff]  ;;  %s792_s26 = smov [#allocation11]  }
  0x4c   :  { %578 = vmatprep.subr.bf16.mxu1 %v789_v0  ;;  %537 = vmatprep.mubr.msk.f32.mxu1 %vm790_vm0, %v791_v1  ;;  %v576_v4 = vpack.c.bf16 %v91_v3, %v90_v2  ;;  %v208_v7 = vld [vmem:[#allocation7 + $0x8] sm:$0xff]  ;;  %v209_v9 = vld [vmem:[#allocation7 + $0x10] sm:$0xff]  ;;  %v210_v10 = vld [vmem:[#allocation7 + $0x18] sm:$0xff]  ;;  %v194_v52 = vshrl.u32 %v193_v51, 7  ;;  %s444_s27 = sshll.u32 %s792_s26, 4  ;;  %s445_s27 = int_to_ptr.vmem [resolvable:$true] %s444_s27 }
  0x4d   :  { %v579_v8 = vpack.c.bf16 %v208_v7, %v207_v6  ;;  %v582_v11 = vpack.c.bf16 %v210_v10, %v209_v9  ;;  %v211_v12 = vld [vmem:[#allocation7 + $0x20] sm:$0xff]  ;;  %v212_v13 = vld [vmem:[#allocation7 + $0x28] sm:$0xff]  ;;  %v213_v15 = vld [vmem:[#allocation7 + $0x30] sm:$0xff]  ;;  %p734_p5 = scmp.lt.s32.totalorder %s445_s27, %s445_s27 }
  0x4e   :  { %577 = vmatpush3.bf16.msra.mxu0 %v576_v4  ;;  %v585_v14 = vpack.c.bf16 %v212_v13, %v211_v12  ;;  %v214_v16 = vld [vmem:[#allocation7 + $0x38] sm:$0xff]  ;;  %v215_v18 = vld [vmem:[#allocation7 + $0x40] sm:$0xff]  ;;  %v216_v19 = vld [vmem:[#allocation7 + $0x48] sm:$0xff]  ;;  %v919_v54 = vsub.s32 0, %v194_v52 }
  0x4f   :  { %602 = vmatprep.subr.bf16.mxu0 %v789_v0  ;;  %580 = vmatpush3.bf16.msra.mxu1 %v579_v8  ;;  %v588_v17 = vpack.c.bf16 %v214_v16, %v213_v15  ;;  %v591_v20 = vpack.c.bf16 %v216_v19, %v215_v18  ;;  %v217_v21 = vld [vmem:[#allocation7 + $0x50] sm:$0xff]  ;;  %v218_v22 = vld [vmem:[#allocation7 + $0x58] sm:$0xff]  ;;  %v219_v24 = vld [vmem:[#allocation7 + $0x60] sm:$0xff] }
  0x50   :  { %581 = vmatprep.subr.bf16.mxu1 %v789_v0  ;;  %v594_v23 = vpack.c.bf16 %v218_v22, %v217_v21  ;;  %v220_v25 = vld [vmem:[#allocation7 + $0x68] sm:$0xff]  ;;  %v221_v27 = vld [vmem:[#allocation7 + $0x70] sm:$0xff]  ;;  %v222_v28 = vld [vmem:[#allocation7 + $0x78] sm:$0xff] }
  0x51   :  { %503 = vmatmul.mubr.msk.f32.vlgmr.msra.gmra.mrb[0].mxu0 %vm92_vm1, %v89_v5  ;;  %v597_v26 = vpack.c.bf16 %v220_v25, %v219_v24  ;;  %v600_v29 = vpack.c.bf16 %v222_v28, %v221_v27  ;;  %v166_v53 = vld [vmem:[%s970_s2] sm:$0x1]  ;;  %v333_v2 = vld [vmem:[#allocation8] sm:$0xff]  ;;  %v335_v5 = vld [vmem:[#allocation8 + $0x10] sm:$0xff] }
  0x52   :  { %572 = vmatprep.mubr.msk.f32.mxu0 %vm790_vm0, %v791_v1  ;;  %v167_v57 = vld [vmem:[%s971_s3] sm:$0x1]  ;;  %v336_v6 = vld [vmem:[#allocation8 + $0x18] sm:$0xff]  ;;  %v337_v8 = vld [vmem:[#allocation8 + $0x20] sm:$0xff] }
  0x53   :  { %583 = vmatpush3.bf16.msra.mxu1 %v582_v11  ;;  %v334_v3 = vld [vmem:[#allocation8 + $0x8] sm:$0xff]  ;;  %v606_v7 = vpack.c.bf16 %v336_v6, %v335_v5  ;;  %v339_v11 = vld [vmem:[#allocation8 + $0x30] sm:$0xff]  ;;  %v340_v12 = vld [vmem:[#allocation8 + $0x38] sm:$0xff] }
  0x54   :  { %584 = vmatprep.subr.bf16.mxu1 %v789_v0  ;;  %v603_v4 = vpack.c.bf16 %v334_v3, %v333_v2  ;;  %v338_v9 = vld [vmem:[#allocation8 + $0x28] sm:$0xff]  ;;  %v612_v13 = vpack.c.bf16 %v340_v12, %v339_v11  ;;  %v344_v18 = vld [vmem:[#allocation8 + $0x58] sm:$0xff] }
  0x55   :  { %v609_v10 = vpack.c.bf16 %v338_v9, %v337_v8  ;;  %v342_v15 = vld [vmem:[#allocation8 + $0x48] sm:$0xff]  ;;  %v348_v24 = vld [vmem:[#allocation8 + $0x78] sm:$0xff] }
  0x56   :  { %604 = vmatpush3.bf16.msra.mxu0 %v603_v4  ;;  %v346_v21 = vld [vmem:[#allocation8 + $0x68] sm:$0xff] }
  0x57   :  { %586 = vmatpush3.bf16.msra.mxu1 %v585_v14  ;;  %605 = vmatprep.subr.bf16.mxu0 %v789_v0  ;;  %v341_v14 = vld [vmem:[#allocation8 + $0x40] sm:$0xff] }
  0x58   :  { %587 = vmatprep.subr.bf16.mxu1 %v789_v0  ;;  %v615_v16 = vpack.c.bf16 %v342_v15, %v341_v14 }
  0x5a   :  { %607 = vmatpush3.bf16.msra.mxu0 %v606_v7 }
  0x5b   :  { %589 = vmatpush3.bf16.msra.mxu1 %v588_v17  ;;  %608 = vmatprep.subr.bf16.mxu0 %v789_v0  ;;  %v343_v17 = vld [vmem:[#allocation8 + $0x50] sm:$0xff] }
  0x5c   :  { %590 = vmatprep.subr.bf16.mxu1 %v789_v0  ;;  %v618_v19 = vpack.c.bf16 %v344_v18, %v343_v17 }
  0x5e   :  { %610 = vmatpush3.bf16.msra.mxu0 %v609_v10 }
  0x5f   :  { %592 = vmatpush3.bf16.msra.mxu1 %v591_v20  ;;  %611 = vmatprep.subr.bf16.mxu0 %v789_v0  ;;  %v345_v20 = vld [vmem:[#allocation8 + $0x60] sm:$0xff] }
  0x60   :  { %593 = vmatprep.subr.bf16.mxu1 %v789_v0  ;;  %v621_v22 = vpack.c.bf16 %v346_v21, %v345_v20 }
  0x62   :  { %613 = vmatpush3.bf16.msra.mxu0 %v612_v13 }
  0x63   :  { %595 = vmatpush3.bf16.msra.mxu1 %v594_v23  ;;  %614 = vmatprep.subr.bf16.mxu0 %v789_v0  ;;  %v347_v23 = vld [vmem:[#allocation8 + $0x70] sm:$0xff] }
  0x64   :  { %596 = vmatprep.subr.bf16.mxu1 %v789_v0  ;;  %v624_v25 = vpack.c.bf16 %v348_v24, %v347_v23 }
  0x66   :  { %616 = vmatpush3.bf16.msra.mxu0 %v615_v16 }
  0x67   :  { %598 = vmatpush3.bf16.msra.mxu1 %v597_v26  ;;  %617 = vmatprep.subr.bf16.mxu0 %v789_v0 }
  0x68   :  { %599 = vmatprep.subr.bf16.mxu1 %v789_v0 }
  0x6a   :  { %619 = vmatpush3.bf16.msra.mxu0 %v618_v19 }
  0x6b   :  { %601 = vmatpush3.bf16.msra.mxu1 %v600_v29  ;;  %620 = vmatprep.subr.bf16.mxu0 %v789_v0 }
  0x6e   :  { %622 = vmatpush3.bf16.msra.mxu0 %v621_v22 }
  0x6f   :  { %623 = vmatprep.subr.bf16.mxu0 %v789_v0 }
  0x72   :  { %625 = vmatpush3.bf16.msra.mxu0 %v624_v25 }
 0x124   :  { %v162_v30 = vpop.f32.mrb[0].mxu0 }
 0x125   :  { %v168_v31 = vrot.slane %v162_v30, 4  ;;  %v176_v32 = vmul.f32 %v162_v30, %v162_v30  ;;  %v504_v33 = vpop.f32.mrb[1].mxu0 }
 0x127   :  { %v169_v34 = vadd.f32 %v168_v31, %v162_v30  ;;  %v177_v35 = vrot.slane %v176_v32, 4 }
 0x129   :  { %v170_v36 = vrot.slane %v169_v34, 2  ;;  %v178_v37 = vadd.f32 %v177_v35, %v176_v32 }
 0x12b   :  { %v171_v38 = vadd.f32 %v170_v36, %v169_v34  ;;  %v179_v39 = vrot.slane %v178_v37, 2 }
 0x12d   :  { %v172_v40 = vrot.slane %v171_v38, 1  ;;  %v180_v41 = vadd.f32 %v179_v39, %v178_v37 }
 0x12f   :  { %v173_v42 = vadd.f32 %v172_v40, %v171_v38  ;;  %v181_v43 = vrot.slane %v180_v41, 1 }
 0x131   :  { %v175_v44 = vmul.f32 0.125, %v173_v42  ;;  %v182_v45 = vadd.f32 %v181_v43, %v180_v41 }
 0x133   :  { %v183_v46 = vmul.f32 0.125, %v182_v45  ;;  %v184_v47 = vmul.f32 %v175_v44, %v175_v44 }
 0x135   :  { %v185_v48 = vsub.f32 %v183_v46, %v184_v47  ;;  %v293_v46 = vld [vmem:[%s973_s5] sm:$0x1]  ;;  %s729_s5 = scalar_lea.vmem %s445_s27, 128 }
 0x136   :  { %p730_p4 = scmp.ne.s32.totalorder %s445_s27, %s729_s5  ;;  %p735_p6 = scmp.lt.s32.totalorder %s729_s5, %s729_s5 }
 0x137   :  { %v186_v49 = vmax.f32 %v185_v48, 0.0 }
 0x138   :  { %p736_p7 = por %p735_p6, %p734_p5 }
 0x139   :  { %v187_v50 = vadd.f32 1e-05, %v186_v49  ;;  %v294_v49 = vld [vmem:[%s974_s6] sm:$0x1] }
 0x13a   :  { %p737_p8 = pnand %p736_p7, %p730_p4 }
 0x13b   :  { %637 = vrsqrt.f32 %v187_v50 }
 0x145   :  { %v638_v55 = vpop.eup %637 }
 0x146   :  { %v189_v56 = vmul.f32 %v638_v55, %v166_v53 }
 0x148   :  { %v196_v58 = vrot.slane %v189_v56, %v919_v54  ;;  %v190_v59 = vmul.f32 %v189_v56, %v175_v44 }
 0x14a   :  { %v191_v60 = vsub.f32 %v167_v57, %v190_v59  ;;  %v198_v61 = vmul.f32 %v196_v58, %v162_v30 }
 0x14c   :  { %v203_v62 = vrot.slane %v191_v60, %v919_v54 }
 0x14e   :  { %v205_v63 = vadd.f32 %v203_v62, %v198_v61 }
 0x150   :  { %v206_v1 = vmax.f32 %v205_v63, 0.0 }
 0x152   :  { %538 = vmatmul.mubr.f32.vlgmr.msra.gmra.mrb[0].mxu1 %v206_v1 }
 0x225   :  { %v289_v26 = vpop.f32.mrb[0].mxu1 }
 0x226   :  { %v295_v27 = vrot.slane %v289_v26, 4  ;;  %v302_v28 = vmul.f32 %v289_v26, %v289_v26  ;;  %v539_v29 = vpop.f32.mrb[1].mxu1 }
 0x228   :  { %v296_v30 = vadd.f32 %v295_v27, %v289_v26  ;;  %v303_v31 = vrot.slane %v302_v28, 4 }
 0x22a   :  { %v297_v32 = vrot.slane %v296_v30, 2  ;;  %v304_v33 = vadd.f32 %v303_v31, %v302_v28 }
 0x22c   :  { %v298_v34 = vadd.f32 %v297_v32, %v296_v30  ;;  %v305_v35 = vrot.slane %v304_v33, 2 }
 0x22e   :  { %v299_v36 = vrot.slane %v298_v34, 1  ;;  %v306_v37 = vadd.f32 %v305_v35, %v304_v33 }
 0x230   :  { %v300_v38 = vadd.f32 %v299_v36, %v298_v34  ;;  %v307_v39 = vrot.slane %v306_v37, 1 }
 0x232   :  { %v301_v40 = vmul.f32 0.125, %v300_v38  ;;  %v308_v0 = vadd.f32 %v307_v39, %v306_v37 }
 0x234   :  { %v309_v41 = vmul.f32 0.125, %v308_v0  ;;  %v310_v42 = vmul.f32 %v301_v40, %v301_v40 }
 0x236   :  { %v311_v43 = vsub.f32 %v309_v41, %v310_v42 }
 0x238   :  { %v312_v44 = vmax.f32 %v311_v43, 0.0 }
 0x23a   :  { %v313_v45 = vadd.f32 1e-05, %v312_v44 }
 0x23c   :  { %639 = vrsqrt.f32 %v313_v45 }
 0x246   :  { %v640_v47 = vpop.eup %639 }
 0x247   :  { %v315_v48 = vmul.f32 %v640_v47, %v293_v46 }
 0x249   :  { %v316_v50 = vmul.f32 %v315_v48, %v301_v40  ;;  %v322_v51 = vrot.slane %v315_v48, %v919_v54 }
 0x24b   :  { %v317_v52 = vsub.f32 %v294_v49, %v316_v50  ;;  %v324_v53 = vmul.f32 %v322_v51, %v289_v26 }
 0x24d   :  { %v329_v55 = vrot.slane %v317_v52, %v919_v54 }
 0x24f   :  { %v331_v56 = vadd.f32 %v329_v55, %v324_v53 }
 0x251   :  { %v332_v57 = vmax.f32 %v331_v56, 0.0 }
 0x253   :  { %573 = vmatmul.mubr.f32.vlgmr.msra.gmra.mrb[2].mxu0 %v332_v57  ;;  %426 = vst [vmem:[#allocation11] sm:$0xff] %v332_v57 }
 0x254   :  { %740 = shalt.err (!%p737_p8)
}
 0x255   :  { %s741_s11 = scalar_lea.hbm %s978_s10, 128 }
 0x256   :  { %p742_p9 = scmp.ne.s32.totalorder %s978_s10, %s741_s11  ;;  %p745_p10 = scmp.lt.u32.totalorder %s741_s11, %s978_s10 }
 0x258   :  { %p747_p11 = pnand %p745_p10, %p742_p9 }
 0x25a   :  { %750 = shalt.err (!%p747_p11)
}
 0x25b   :  { %447 = dma.vmem_to_hbm [thread:$0]  %s445_s27, 128, %s978_s10, [#allocation12]   ;;  %v460_v54 = vld [vmem:[%s976_s8] ss:$0 sm:$0xff] }
 0x25c   :  { %s793_s1 = smov [#allocation10]  }
 0x25d   :  { %s434_s14 = sshll.u32 %s793_s1, 4  ;;  %s435_s14 = int_to_ptr.vmem [resolvable:$true] %s434_s14 }
 0x25e   :  { %s751_s19 = scalar_lea.vmem %s435_s14, 128  ;;  %p756_p13 = scmp.lt.s32.totalorder %s435_s14, %s435_s14 }
 0x25f   :  { %p752_p12 = scmp.ne.s32.totalorder %s435_s14, %s751_s19  ;;  %p757_p0 = scmp.lt.s32.totalorder %s751_s19, %s751_s19 }
 0x261   :  { %p758_p1 = por %p757_p0, %p756_p13 }
 0x263   :  { %p759_p2 = pnand %p758_p1, %p752_p12 }
 0x326   :  { %v422_v58 = vpop.f32.mrb[2].mxu0 }
 0x327   :  { %v423_v59 = vadd.f32 %v460_v54, %v422_v58  ;;  %v574_v60 = vpop.f32.mrb[3].mxu0 }
 0x329   :  { %427 = vst [vmem:[#allocation10] sm:$0xff] %v423_v59 }
 0x32a   :  { %762 = shalt.err (!%p759_p2)
}
 0x32b   :  { %s763_s4 = scalar_lea.hbm %s977_s9, 128 }
 0x32c   :  { %p764_p3 = scmp.ne.s32.totalorder %s977_s9, %s763_s4  ;;  %p767_p4 = scmp.lt.u32.totalorder %s763_s4, %s977_s9 }
 0x32e   :  { %p769_p5 = pnand %p767_p4, %p764_p3 }
 0x330   :  { %772 = shalt.err (!%p769_p5)
}
 0x331   :  { %437 = dma.vmem_to_hbm [thread:$0]  %s435_s14, 128, %s977_s9, [#allocation4]  }
 0x332   :  { %779 = dma.done.wait [#allocation4], 128  }
 0x333   :  { %780 = vsyncadd [#allocation4], 4294967168 }
 0x334   :  { %781 = dma.done.wait [#allocation12], 128  }
 0x335   :  { %782 = vsyncadd [#allocation12], 4294967168 }
 0x336   :  { %454 = vsyncpa [#allocation3], 1 }
 0x337   :  { %455 = vsyncpa [#allocation6], 1 }
 0x338   :  { %456 = vsyncpa [#allocation9], 1 }
 0x339   :  { %457 = vsyncpa [#allocation4], 1 }
 0x33a   :  { %458 = vsyncpa [#allocation12], 1 }

// kernel: tpu_custom_call.1
= control target key start
LH: loop header
LB: loop body
LE: loop exit
PB: predicated region body
PF: predicated region fallthrough
CT: control target
= control target key end

     0   :  { %16 = vsyncpa [#allocation3], 0  ;;  %s968_s0 = inlined_call_operand.hbm [shape: f32[1,8,16], index: 0, kind: input, shape index: {}]   ;;  %s969_s1 = inlined_call_operand.hbm [shape: f32[16,128], index: 1, kind: input, shape index: {}]   ;;  %s970_s2 = inlined_call_operand.vmem [shape: f32[1,128], index: 2, kind: input, shape index: {}]   ;;  %s971_s3 = inlined_call_operand.vmem [shape: f32[1,128], index: 3, kind: input, shape index: {}]   ;;  %s972_s4 = inlined_call_operand.hbm [shape: f32[128,128], index: 4, kind: input, shape index: {}]   ;;  %s973_s5 = inlined_call_operand.vmem [shape: f32[1,128], index: 5, kind: input, shape index: {}]   ;;  %s974_s6 = inlined_call_operand.vmem [shape: f32[1,128], index: 6, kind: input, shape index: {}]   ;;  %s975_s7 = inlined_call_operand.hbm [shape: f32[128,128], index: 7, kind: input, shape index: {}]   ;;  %s976_s8 = inlined_call_operand.vmem [shape: f32[1,128], index: 8, kind: input, shape index: {}]   ;;  %s977_s9 = inlined_call_operand.hbm [shape: f32[1,8,128], index: 9, kind: output, shape index: {0}]   ;;  %s978_s10 = inlined_call_operand.hbm [shape: f32[1,8,128], index: 10, kind: output, shape index: {1}]  }
   0x1   :  { %17 = vsyncpa [#allocation6], 0 }
   0x2   :  { %18 = vsyncpa [#allocation9], 0 }
   0x3   :  { %19 = vsyncpa [#allocation4], 0 }
   0x4   :  { %20 = vsyncpa [#allocation12], 0  ;;  %s783_s13 = smov [#allocation5]   ;;  %s641_s17 = scalar_lea.hbm %s969_s1, 256 }
   0x5   :  { %s36_s14 = sshll.u32 %s783_s13, 4  ;;  %p642_p0 = scmp.ne.s32.totalorder %s969_s1, %s641_s17  ;;  %s37_s14 = int_to_ptr.vmem [resolvable:$true] %s36_s14 }
   0x6   :  { %p645_p1 = scmp.lt.u32.totalorder %s641_s17, %s969_s1 }
   0x8   :  { %p647_p2 = pnand %p645_p1, %p642_p0 }
   0xa   :  { %650 = shalt.err (!%p647_p2)
}
   0xb   :  { %s651_s22 = scalar_lea.vmem %s37_s14, 256  ;;  %p656_p4 = scmp.lt.s32.totalorder %s37_s14, %s37_s14 }
   0xc   :  { %p652_p3 = scmp.ne.s32.totalorder %s37_s14, %s651_s22  ;;  %p657_p5 = scmp.lt.s32.totalorder %s651_s22, %s651_s22 }
   0xe   :  { %p658_p6 = por %p657_p5, %p656_p4 }
  0x10   :  { %p659_p7 = pnand %p658_p6, %p652_p3 }
  0x12   :  { %662 = shalt.err (!%p659_p7)
}
  0x13   :  { %s784_s23 = smov 128   ;;  %s785_s24 = smov 8  }
  0x14   :  { %42 = dma.hbm_to_vmem [thread:$0]  %s969_s1, 256, %s37_s14, [#allocation6], %s784_s23, %s784_s23, %s785_s24  }
  0x15   :  { %s786_s27 = smov [#allocation2]   ;;  %s787_s29 = smov [#allocation7]  }
  0x16   :  { %s27_s28 = sshll.u32 %s786_s27, 4  ;;  %s52_s30 = sshll.u32 %s787_s29, 4  ;;  %s28_s28 = int_to_ptr.vmem [resolvable:$true] %s27_s28  ;;  %s53_s30 = int_to_ptr.vmem [resolvable:$true] %s52_s30 }
  0x17   :  { %s663_s13 = scalar_lea.hbm %s968_s0, 128 }
  0x18   :  { %p664_p8 = scmp.ne.s32.totalorder %s968_s0, %s663_s13  ;;  %p667_p9 = scmp.lt.u32.totalorder %s663_s13, %s968_s0 }
  0x1a   :  { %p669_p10 = pnand %p667_p9, %p664_p8 }
  0x1c   :  { %672 = shalt.err (!%p669_p10)
}
  0x1d   :  { %s673_s1 = scalar_lea.vmem %s28_s28, 128  ;;  %p678_p12 = scmp.lt.s32.totalorder %s28_s28, %s28_s28 }
  0x1e   :  { %p674_p11 = scmp.ne.s32.totalorder %s28_s28, %s673_s1  ;;  %p679_p13 = scmp.lt.s32.totalorder %s673_s1, %s673_s1 }
  0x20   :  { %p680_p0 = por %p679_p13, %p678_p12 }
  0x22   :  { %p681_p1 = pnand %p680_p0, %p674_p11 }
  0x24   :  { %684 = shalt.err (!%p681_p1)
}
  0x25   :  { %30 = dma.hbm_to_vmem [thread:$0]  %s968_s0, 128, %s28_s28, [#allocation3]  }
  0x26   :  { %s685_s22 = scalar_lea.hbm %s972_s4, 2048 }
  0x27   :  { %p686_p2 = scmp.ne.s32.totalorder %s972_s4, %s685_s22  ;;  %p689_p3 = scmp.lt.u32.totalorder %s685_s22, %s972_s4 }
  0x29   :  { %p691_p4 = pnand %p689_p3, %p686_p2 }
  0x2b   :  { %694 = shalt.err (!%p691_p4)
}
  0x2c   :  { %s695_s11 = scalar_lea.vmem %s53_s30, 2048  ;;  %p700_p6 = scmp.lt.s32.totalorder %s53_s30, %s53_s30 }
  0x2d   :  { %p696_p5 = scmp.ne.s32.totalorder %s53_s30, %s695_s11  ;;  %p701_p7 = scmp.lt.s32.totalorder %s695_s11, %s695_s11 }
  0x2f   :  { %p702_p8 = por %p701_p7, %p700_p6 }
  0x31   :  { %p703_p9 = pnand %p702_p8, %p696_p5 }
  0x33   :  { %706 = shalt.err (!%p703_p9)
}
  0x34   :  { %58 = dma.hbm_to_vmem [thread:$0]  %s972_s4, 2048, %s53_s30, [#allocation6], %s784_s23, %s784_s23, %s785_s24  }
  0x35   :  { %s788_s12 = smov [#allocation8]   ;;  %s707_s17 = scalar_lea.hbm %s975_s7, 2048 }
  0x36   :  { %s68_s13 = sshll.u32 %s788_s12, 4  ;;  %p708_p10 = scmp.ne.s32.totalorder %s975_s7, %s707_s17  ;;  %s69_s13 = int_to_ptr.vmem [resolvable:$true] %s68_s13 }
  0x37   :  { %p711_p11 = scmp.lt.u32.totalorder %s707_s17, %s975_s7 }
  0x39   :  { %p713_p12 = pnand %p711_p11, %p708_p10 }
  0x3b   :  { %716 = shalt.err (!%p713_p12)
}
  0x3c   :  { %s717_s20 = scalar_lea.vmem %s69_s13, 2048  ;;  %p722_p0 = scmp.lt.s32.totalorder %s69_s13, %s69_s13 }
  0x3d   :  { %p718_p13 = scmp.ne.s32.totalorder %s69_s13, %s717_s20  ;;  %p723_p1 = scmp.lt.s32.totalorder %s717_s20, %s717_s20 }
  0x3f   :  { %p724_p2 = por %p723_p1, %p722_p0 }
  0x41   :  { %p725_p3 = pnand %p724_p2, %p718_p13 }
  0x43   :  { %728 = shalt.err (!%p725_p3)
}
  0x44   :  { %74 = dma.hbm_to_vmem [thread:$0]  %s975_s7, 2048, %s69_s13, [#allocation9], %s784_s23, %s784_s23, %s785_s24  }
  0x45   :  { %773 = dma.done.wait [#allocation3], 128  }
  0x46   :  { %774 = vsyncadd [#allocation3], 4294967168 }
  0x47   :  { %775 = dma.done.wait [#allocation6], 2304  }
  0x48   :  { %776 = vsyncadd [#allocation6], 4294964992 }
  0x49   :  { %777 = dma.done.wait [#allocation9], 2048  }
  0x4a   :  { %778 = vsyncadd [#allocation9], 4294965248  ;;  %v789_v0 = vmov 0.0|0.0   ;;  %vm790_vm0 = vmmov 0   ;;  %v791_v1 = vmov 0.0   ;;  %v90_v2 = vld [vmem:[#allocation5] sm:$0xff]  ;;  %v193_v51 = vlaneseq }
  0x4b   :  { %575 = vmatprep.subr.bf16.mxu0 %v789_v0  ;;  %502 = vmatprep.mubr.msk.f32.mxu0 %vm790_vm0, %v791_v1  ;;  %v91_v3 = vld [vmem:[#allocation5 + $0x8] sm:$0xff]  ;;  %v89_v5 = vld [vmem:[#allocation2] sm:$0xff]  ;;  %vm92_vm1 = vcmask 130048   ;;  %v207_v6 = vld [vmem:[#allocation7] sm:$0xff]  ;;  %s792_s26 = smov [#allocation11]  }
  0x4c   :  { %578 = vmatprep.subr.bf16.mxu1 %v789_v0  ;;  %537 = vmatprep.mubr.msk.f32.mxu1 %vm790_vm0, %v791_v1  ;;  %v576_v4 = vpack.c.bf16 %v91_v3, %v90_v2  ;;  %v208_v7 = vld [vmem:[#allocation7 + $0x8] sm:$0xff]  ;;  %v209_v9 = vld [vmem:[#allocation7 + $0x10] sm:$0xff]  ;;  %v210_v10 = vld [vmem:[#allocation7 + $0x18] sm:$0xff]  ;;  %v194_v52 = vshrl.u32 %v193_v51, 7  ;;  %s444_s27 = sshll.u32 %s792_s26, 4  ;;  %s445_s27 = int_to_ptr.vmem [resolvable:$true] %s444_s27 }
  0x4d   :  { %v579_v8 = vpack.c.bf16 %v208_v7, %v207_v6  ;;  %v582_v11 = vpack.c.bf16 %v210_v10, %v209_v9  ;;  %v211_v12 = vld [vmem:[#allocation7 + $0x20] sm:$0xff]  ;;  %v212_v13 = vld [vmem:[#allocation7 + $0x28] sm:$0xff]  ;;  %v213_v15 = vld [vmem:[#allocation7 + $0x30] sm:$0xff]  ;;  %p734_p5 = scmp.lt.s32.totalorder %s445_s27, %s445_s27 }
  0x4e   :  { %577 = vmatpush3.bf16.msra.mxu0 %v576_v4  ;;  %v585_v14 = vpack.c.bf16 %v212_v13, %v211_v12  ;;  %v214_v16 = vld [vmem:[#allocation7 + $0x38] sm:$0xff]  ;;  %v215_v18 = vld [vmem:[#allocation7 + $0x40] sm:$0xff]  ;;  %v216_v19 = vld [vmem:[#allocation7 + $0x48] sm:$0xff]  ;;  %v919_v54 = vsub.s32 0, %v194_v52 }
  0x4f   :  { %602 = vmatprep.subr.bf16.mxu0 %v789_v0  ;;  %580 = vmatpush3.bf16.msra.mxu1 %v579_v8  ;;  %v588_v17 = vpack.c.bf16 %v214_v16, %v213_v15  ;;  %v591_v20 = vpack.c.bf16 %v216_v19, %v215_v18  ;;  %v217_v21 = vld [vmem:[#allocation7 + $0x50] sm:$0xff]  ;;  %v218_v22 = vld [vmem:[#allocation7 + $0x58] sm:$0xff]  ;;  %v219_v24 = vld [vmem:[#allocation7 + $0x60] sm:$0xff] }
  0x50   :  { %581 = vmatprep.subr.bf16.mxu1 %v789_v0  ;;  %v594_v23 = vpack.c.bf16 %v218_v22, %v217_v21  ;;  %v220_v25 = vld [vmem:[#allocation7 + $0x68] sm:$0xff]  ;;  %v221_v27 = vld [vmem:[#allocation7 + $0x70] sm:$0xff]  ;;  %v222_v28 = vld [vmem:[#allocation7 + $0x78] sm:$0xff] }
  0x51   :  { %503 = vmatmul.mubr.msk.f32.vlgmr.msra.gmra.mrb[0].mxu0 %vm92_vm1, %v89_v5  ;;  %v597_v26 = vpack.c.bf16 %v220_v25, %v219_v24  ;;  %v600_v29 = vpack.c.bf16 %v222_v28, %v221_v27  ;;  %v166_v53 = vld [vmem:[%s970_s2] sm:$0x1]  ;;  %v333_v2 = vld [vmem:[#allocation8] sm:$0xff]  ;;  %v335_v5 = vld [vmem:[#allocation8 + $0x10] sm:$0xff] }
  0x52   :  { %572 = vmatprep.mubr.msk.f32.mxu0 %vm790_vm0, %v791_v1  ;;  %v167_v57 = vld [vmem:[%s971_s3] sm:$0x1]  ;;  %v336_v6 = vld [vmem:[#allocation8 + $0x18] sm:$0xff]  ;;  %v337_v8 = vld [vmem:[#allocation8 + $0x20] sm:$0xff] }
  0x53   :  { %583 = vmatpush3.bf16.msra.mxu1 %v582_v11  ;;  %v334_v3 = vld [vmem:[#allocation8 + $0x8] sm:$0xff]  ;;  %v606_v7 = vpack.c.bf16 %v336_v6, %v335_v5  ;;  %v339_v11 = vld [vmem:[#allocation8 + $0x30] sm:$0xff]  ;;  %v340_v12 = vld [vmem:[#allocation8 + $0x38] sm:$0xff] }
  0x54   :  { %584 = vmatprep.subr.bf16.mxu1 %v789_v0  ;;  %v603_v4 = vpack.c.bf16 %v334_v3, %v333_v2  ;;  %v338_v9 = vld [vmem:[#allocation8 + $0x28] sm:$0xff]  ;;  %v612_v13 = vpack.c.bf16 %v340_v12, %v339_v11  ;;  %v344_v18 = vld [vmem:[#allocation8 + $0x58] sm:$0xff] }
  0x55   :  { %v609_v10 = vpack.c.bf16 %v338_v9, %v337_v8  ;;  %v342_v15 = vld [vmem:[#allocation8 + $0x48] sm:$0xff]  ;;  %v348_v24 = vld [vmem:[#allocation8 + $0x78] sm:$0xff] }
  0x56   :  { %604 = vmatpush3.bf16.msra.mxu0 %v603_v4  ;;  %v346_v21 = vld [vmem:[#allocation8 + $0x68] sm:$0xff] }
  0x57   :  { %586 = vmatpush3.bf16.msra.mxu1 %v585_v14  ;;  %605 = vmatprep.subr.bf16.mxu0 %v789_v0  ;;  %v341_v14 = vld [vmem:[#allocation8 + $0x40] sm:$0xff] }
  0x58   :  { %587 = vmatprep.subr.bf16.mxu1 %v789_v0  ;;  %v615_v16 = vpack.c.bf16 %v342_v15, %v341_v14 }
  0x5a   :  { %607 = vmatpush3.bf16.msra.mxu0 %v606_v7 }
  0x5b   :  { %589 = vmatpush3.bf16.msra.mxu1 %v588_v17  ;;  %608 = vmatprep.subr.bf16.mxu0 %v789_v0  ;;  %v343_v17 = vld [vmem:[#allocation8 + $0x50] sm:$0xff] }
  0x5c   :  { %590 = vmatprep.subr.bf16.mxu1 %v789_v0  ;;  %v618_v19 = vpack.c.bf16 %v344_v18, %v343_v17 }
  0x5e   :  { %610 = vmatpush3.bf16.msra.mxu0 %v609_v10 }
  0x5f   :  { %592 = vmatpush3.bf16.msra.mxu1 %v591_v20  ;;  %611 = vmatprep.subr.bf16.mxu0 %v789_v0  ;;  %v345_v20 = vld [vmem:[#allocation8 + $0x60] sm:$0xff] }
  0x60   :  { %593 = vmatprep.subr.bf16.mxu1 %v789_v0  ;;  %v621_v22 = vpack.c.bf16 %v346_v21, %v345_v20 }
  0x62   :  { %613 = vmatpush3.bf16.msra.mxu0 %v612_v13 }
  0x63   :  { %595 = vmatpush3.bf16.msra.mxu1 %v594_v23  ;;  %614 = vmatprep.subr.bf16.mxu0 %v789_v0  ;;  %v347_v23 = vld [vmem:[#allocation8 + $0x70] sm:$0xff] }
  0x64   :  { %596 = vmatprep.subr.bf16.mxu1 %v789_v0  ;;  %v624_v25 = vpack.c.bf16 %v348_v24, %v347_v23 }
  0x66   :  { %616 = vmatpush3.bf16.msra.mxu0 %v615_v16 }
  0x67   :  { %598 = vmatpush3.bf16.msra.mxu1 %v597_v26  ;;  %617 = vmatprep.subr.bf16.mxu0 %v789_v0 }
  0x68   :  { %599 = vmatprep.subr.bf16.mxu1 %v789_v0 }
  0x6a   :  { %619 = vmatpush3.bf16.msra.mxu0 %v618_v19 }
  0x6b   :  { %601 = vmatpush3.bf16.msra.mxu1 %v600_v29  ;;  %620 = vmatprep.subr.bf16.mxu0 %v789_v0 }
  0x6e   :  { %622 = vmatpush3.bf16.msra.mxu0 %v621_v22 }
  0x6f   :  { %623 = vmatprep.subr.bf16.mxu0 %v789_v0 }
  0x72   :  { %625 = vmatpush3.bf16.msra.mxu0 %v624_v25 }
 0x124   :  { %v162_v30 = vpop.f32.mrb[0].mxu0 }
 0x125   :  { %v168_v31 = vrot.slane %v162_v30, 4  ;;  %v176_v32 = vmul.f32 %v162_v30, %v162_v30  ;;  %v504_v33 = vpop.f32.mrb[1].mxu0 }
 0x127   :  { %v169_v34 = vadd.f32 %v168_v31, %v162_v30  ;;  %v177_v35 = vrot.slane %v176_v32, 4 }
 0x129   :  { %v170_v36 = vrot.slane %v169_v34, 2  ;;  %v178_v37 = vadd.f32 %v177_v35, %v176_v32 }
 0x12b   :  { %v171_v38 = vadd.f32 %v170_v36, %v169_v34  ;;  %v179_v39 = vrot.slane %v178_v37, 2 }
 0x12d   :  { %v172_v40 = vrot.slane %v171_v38, 1  ;;  %v180_v41 = vadd.f32 %v179_v39, %v178_v37 }
 0x12f   :  { %v173_v42 = vadd.f32 %v172_v40, %v171_v38  ;;  %v181_v43 = vrot.slane %v180_v41, 1 }
 0x131   :  { %v175_v44 = vmul.f32 0.125, %v173_v42  ;;  %v182_v45 = vadd.f32 %v181_v43, %v180_v41 }
 0x133   :  { %v183_v46 = vmul.f32 0.125, %v182_v45  ;;  %v184_v47 = vmul.f32 %v175_v44, %v175_v44 }
 0x135   :  { %v185_v48 = vsub.f32 %v183_v46, %v184_v47  ;;  %v293_v46 = vld [vmem:[%s973_s5] sm:$0x1]  ;;  %s729_s5 = scalar_lea.vmem %s445_s27, 128 }
 0x136   :  { %p730_p4 = scmp.ne.s32.totalorder %s445_s27, %s729_s5  ;;  %p735_p6 = scmp.lt.s32.totalorder %s729_s5, %s729_s5 }
 0x137   :  { %v186_v49 = vmax.f32 %v185_v48, 0.0 }
 0x138   :  { %p736_p7 = por %p735_p6, %p734_p5 }
 0x139   :  { %v187_v50 = vadd.f32 1e-05, %v186_v49  ;;  %v294_v49 = vld [vmem:[%s974_s6] sm:$0x1] }
 0x13a   :  { %p737_p8 = pnand %p736_p7, %p730_p4 }
 0x13b   :  { %637 = vrsqrt.f32 %v187_v50 }
 0x145   :  { %v638_v55 = vpop.eup %637 }
 0x146   :  { %v189_v56 = vmul.f32 %v638_v55, %v166_v53 }
 0x148   :  { %v196_v58 = vrot.slane %v189_v56, %v919_v54  ;;  %v190_v59 = vmul.f32 %v189_v56, %v175_v44 }
 0x14a   :  { %v191_v60 = vsub.f32 %v167_v57, %v190_v59  ;;  %v198_v61 = vmul.f32 %v196_v58, %v162_v30 }
 0x14c   :  { %v203_v62 = vrot.slane %v191_v60, %v919_v54 }
 0x14e   :  { %v205_v63 = vadd.f32 %v203_v62, %v198_v61 }
 0x150   :  { %v206_v1 = vmax.f32 %v205_v63, 0.0 }
 0x152   :  { %538 = vmatmul.mubr.f32.vlgmr.msra.gmra.mrb[0].mxu1 %v206_v1 }
 0x225   :  { %v289_v26 = vpop.f32.mrb[0].mxu1 }
 0x226   :  { %v295_v27 = vrot.slane %v289_v26, 4  ;;  %v302_v28 = vmul.f32 %v289_v26, %v289_v26  ;;  %v539_v29 = vpop.f32.mrb[1].mxu1 }
 0x228   :  { %v296_v30 = vadd.f32 %v295_v27, %v289_v26  ;;  %v303_v31 = vrot.slane %v302_v28, 4 }
 0x22a   :  { %v297_v32 = vrot.slane %v296_v30, 2  ;;  %v304_v33 = vadd.f32 %v303_v31, %v302_v28 }
 0x22c   :  { %v298_v34 = vadd.f32 %v297_v32, %v296_v30  ;;  %v305_v35 = vrot.slane %v304_v33, 2 }
 0x22e   :  { %v299_v36 = vrot.slane %v298_v34, 1  ;;  %v306_v37 = vadd.f32 %v305_v35, %v304_v33 }
 0x230   :  { %v300_v38 = vadd.f32 %v299_v36, %v298_v34  ;;  %v307_v39 = vrot.slane %v306_v37, 1 }
 0x232   :  { %v301_v40 = vmul.f32 0.125, %v300_v38  ;;  %v308_v0 = vadd.f32 %v307_v39, %v306_v37 }
 0x234   :  { %v309_v41 = vmul.f32 0.125, %v308_v0  ;;  %v310_v42 = vmul.f32 %v301_v40, %v301_v40 }
 0x236   :  { %v311_v43 = vsub.f32 %v309_v41, %v310_v42 }
 0x238   :  { %v312_v44 = vmax.f32 %v311_v43, 0.0 }
 0x23a   :  { %v313_v45 = vadd.f32 1e-05, %v312_v44 }
 0x23c   :  { %639 = vrsqrt.f32 %v313_v45 }
 0x246   :  { %v640_v47 = vpop.eup %639 }
 0x247   :  { %v315_v48 = vmul.f32 %v640_v47, %v293_v46 }
 0x249   :  { %v316_v50 = vmul.f32 %v315_v48, %v301_v40  ;;  %v322_v51 = vrot.slane %v315_v48, %v919_v54 }
 0x24b   :  { %v317_v52 = vsub.f32 %v294_v49, %v316_v50  ;;  %v324_v53 = vmul.f32 %v322_v51, %v289_v26 }
 0x24d   :  { %v329_v55 = vrot.slane %v317_v52, %v919_v54 }
 0x24f   :  { %v331_v56 = vadd.f32 %v329_v55, %v324_v53 }
 0x251   :  { %v332_v57 = vmax.f32 %v331_v56, 0.0 }
 0x253   :  { %573 = vmatmul.mubr.f32.vlgmr.msra.gmra.mrb[2].mxu0 %v332_v57  ;;  %426 = vst [vmem:[#allocation11] sm:$0xff] %v332_v57 }
 0x254   :  { %740 = shalt.err (!%p737_p8)
}
 0x255   :  { %s741_s11 = scalar_lea.hbm %s978_s10, 128 }
 0x256   :  { %p742_p9 = scmp.ne.s32.totalorder %s978_s10, %s741_s11  ;;  %p745_p10 = scmp.lt.u32.totalorder %s741_s11, %s978_s10 }
 0x258   :  { %p747_p11 = pnand %p745_p10, %p742_p9 }
 0x25a   :  { %750 = shalt.err (!%p747_p11)
}
 0x25b   :  { %447 = dma.vmem_to_hbm [thread:$0]  %s445_s27, 128, %s978_s10, [#allocation12]   ;;  %v460_v54 = vld [vmem:[%s976_s8] ss:$0 sm:$0xff] }
 0x25c   :  { %s793_s1 = smov [#allocation10]  }
 0x25d   :  { %s434_s14 = sshll.u32 %s793_s1, 4  ;;  %s435_s14 = int_to_ptr.vmem [resolvable:$true] %s434_s14 }
 0x25e   :  { %s751_s19 = scalar_lea.vmem %s435_s14, 128  ;;  %p756_p13 = scmp.lt.s32.totalorder %s435_s14, %s435_s14 }
 0x25f   :  { %p752_p12 = scmp.ne.s32.totalorder %s435_s14, %s751_s19  ;;  %p757_p0 = scmp.lt.s32.totalorder %s751_s19, %s751_s19 }
 0x261   :  { %p758_p1 = por %p757_p0, %p756_p13 }
 0x263   :  { %p759_p2 = pnand %p758_p1, %p752_p12 }
 0x326   :  { %v422_v58 = vpop.f32.mrb[2].mxu0 }
 0x327   :  { %v423_v59 = vadd.f32 %v460_v54, %v422_v58  ;;  %v574_v60 = vpop.f32.mrb[3].mxu0 }
 0x329   :  { %427 = vst [vmem:[#allocation10] sm:$0xff] %v423_v59 }
 0x32a   :  { %762 = shalt.err (!%p759_p2)
}
 0x32b   :  { %s763_s4 = scalar_lea.hbm %s977_s9, 128 }
 0x32c   :  { %p764_p3 = scmp.ne.s32.totalorder %s977_s9, %s763_s4  ;;  %p767_p4 = scmp.lt.u32.totalorder %s763_s4, %s977_s9 }
 0x32e   :  { %p769_p5 = pnand %p767_p4, %p764_p3 }
 0x330   :  { %772 = shalt.err (!%p769_p5)
}
 0x331   :  { %437 = dma.vmem_to_hbm [thread:$0]  %s435_s14, 128, %s977_s9, [#allocation4]  }
 0x332   :  { %779 = dma.done.wait [#allocation4], 128  }
 0x333   :  { %780 = vsyncadd [#allocation4], 4294967168 }
 0x334   :  { %781 = dma.done.wait [#allocation12], 128  }
 0x335   :  { %782 = vsyncadd [#allocation12], 4294967168 }
 0x336   :  { %454 = vsyncpa [#allocation3], 1 }
 0x337   :  { %455 = vsyncpa [#allocation6], 1 }
 0x338   :  { %456 = vsyncpa [#allocation9], 1 }
 0x339   :  { %457 = vsyncpa [#allocation4], 1 }
 0x33a   :  { %458 = vsyncpa [#allocation12], 1 }

</bundles_post_ra>
